<compile_context>
chip_gen: v6e
topology: v6e:2x2x1
jax: 0.10.0
libtpu: 0.0.40
codegen_flags: <defaults>
</compile_context>

<pallas_src>
import functools
import math

import jax
import jax.numpy as jnp
from jax.experimental import pallas as pl
from jax.experimental.pallas import tpu as pltpu


def _cdiv(a, b):
    return -(-a // b)


def _rotary_kernel(inv_freq_ref, sub_ref, out_ref, *, fold, chunk_rows):
    # inv_freq_ref : (1, width) VMEM, inv_freq tiled `fold` times
    # sub_ref      : (1, width) VMEM, folded sub-position (lane // half) as f32
    # out_ref      : (2, tile_rows, width) VMEM output block; [0]=cos, [1]=sin
    tile_rows = out_ref.shape[1]
    n_chunks = tile_rows // chunk_rows

    i = pl.program_id(0)
    tile_start = i * tile_rows                       # first (folded) row of this tile

    inv = inv_freq_ref[...]                          # (1, width)
    # In-chunk row offsets, hoisted out of the chunk loop.
    row = jax.lax.broadcasted_iota(jnp.int32, (chunk_rows, 1), 0).astype(jnp.float32)
    if fold > 1:
        sub = sub_ref[...]                           # (1, width)
        fold_f = jnp.float32(fold)

    def chunk_body(c, carry):
        r0 = pl.multiple_of(c * chunk_rows, chunk_rows)
        start_f = (tile_start + r0).astype(jnp.float32)
        if fold > 1:
            # Sequence position of element (r, l): (tile_start + r)*fold + l//half.
            # All terms are small integers -> exact in f32 (matches torch outer()).
            pos = (row + start_f) * fold_f + sub     # (chunk_rows, width)
        else:
            pos = row + start_f                      # (chunk_rows, 1) -> broadcast
        freqs = pos * inv                            # (chunk_rows, width)
        out_ref[0, pl.ds(r0, chunk_rows), :] = jnp.cos(freqs)
        out_ref[1, pl.ds(r0, chunk_rows), :] = jnp.sin(freqs)
        return carry

    jax.lax.fori_loop(0, n_chunks, chunk_body, None, unroll=True)


def make_rotary_tables(dim, base=10000, seq_len=1024,
                       vmem_block_budget_bytes=2 << 20, chunk_rows=256):
    """Compute the (seq_len, dim//2) cos / sin tables with a Pallas TPU kernel."""
    assert dim % 2 == 0, "rotary dim must be even"
    half = dim // 2

    # Fold consecutive sequence rows so the output last dim is a multiple of 128
    # lanes (unmasked full-width stores for any half: 32, 48, 64, 80, 96, ...).
    fold = math.lcm(half, 128) // half
    width = fold * half

    rows_needed = _cdiv(seq_len, fold)

    # Row capacity of the fused (2, tile_rows, width) f32 block within budget
    # (~2 MiB -> ~4 MiB double-buffered; safe on v5e/v6e/v7x scoped VMEM).
    cap_rows = max(8, vmem_block_budget_bytes // (2 * width * 4))

    # Target at least two grid steps so v7x can shard the parallel axis across
    # both TensorCores (no effect on single-TC v5e / v6e).
    target = _cdiv(rows_needed, 2) if rows_needed >= 16 else rows_needed
    tile_rows = max(8, min(cap_rows, target))
    if tile_rows >= chunk_rows:
        tile_rows = (tile_rows // chunk_rows) * chunk_rows   # stay within budget
        inner_chunk = chunk_rows
    else:
        tile_rows = _cdiv(tile_rows, 8) * 8                  # (8,128) sublane rule
        inner_chunk = tile_rows

    grid_n = _cdiv(rows_needed, tile_rows)
    rows = grid_n * tile_rows            # padded row count; sliced back below
    padded_seq = rows * fold

    # inv_freq exactly as in the torch module, pre-tiled to the folded layout,
    # plus the folded sub-position offsets (lane // half) as f32.
    inv_freq = 1.0 / (base ** (jnp.arange(0, dim, 2, dtype=jnp.float32) / dim))
    inv_freq_tiled = jnp.tile(inv_freq, fold).reshape(1, width)
    sub_tiled = jnp.repeat(
        jnp.arange(fold, dtype=jnp.float32), half).reshape(1, width)

    kernel = functools.partial(_rotary_kernel, fold=fold, chunk_rows=inner_chunk)

    out = pl.pallas_call(
        kernel,
        out_shape=jax.ShapeDtypeStruct((2, rows, width), jnp.float32),
        grid_spec=pltpu.PrefetchScalarGridSpec(
            num_scalar_prefetch=0,
            grid=(grid_n,),
            in_specs=[
                pl.BlockSpec((1, width), lambda i: (0, 0)),
                pl.BlockSpec((1, width), lambda i: (0, 0)),
            ],
            out_specs=pl.BlockSpec((2, tile_rows, width), lambda i: (0, i, 0)),
        ),
        compiler_params=pltpu.CompilerParams(
            dimension_semantics=("parallel",),
        ),
    )(inv_freq_tiled, sub_tiled)

    # Row-major (rows, width) -> (rows*fold, half) is an identity reshape; drop
    # the padded tail positions.
    cos = out[0].reshape(padded_seq, half)[:seq_len]
    sin = out[1].reshape(padded_seq, half)[:seq_len]
    return cos, sin


class Rotary:
    """JAX/Pallas port of the PyTorch Rotary module."""

    def __init__(self, dim, base=10000, seq_len=1024):
        self.cos, self.sin = make_rotary_tables(dim, base=base, seq_len=seq_len)

    def __call__(self, x):
        # x: (B, T, H, D); x.shape[-3] == T, matching x.size(-3) in torch.
        T = x.shape[-3]
        if T > self.cos.shape[0]:
            raise ValueError(
                f"sequence length {T} exceeds precomputed rotary table "
                f"length {self.cos.shape[0]}")
        return (
            self.cos[None, :T, None, :],
            self.sin[None, :T, None, :],
        )


if __name__ == "__main__":
    key = jax.random.PRNGKey(0)
    B, T, H, D = 2, 8, 4, 64          # head_dim = 64 -> half = 32, fold = 4
    x = jax.random.normal(key, (B, T, H, D), dtype=jnp.float32)

    def ref_freqs(dim, base, seq_len):
        inv_freq = 1.0 / (base ** (jnp.arange(0, dim, 2, dtype=jnp.float32) / dim))
        t = jnp.arange(seq_len, dtype=jnp.float32)
        return jnp.outer(t, inv_freq)

    SEQ = 128
    rot = Rotary(dim=D, base=10000, seq_len=SEQ)
    cos, sin = rot(x)
    cos = jax.block_until_ready(cos)
    sin = jax.block_until_ready(sin)

    freqs = ref_freqs(D, 10000.0, SEQ)
    ref_cos = jnp.cos(freqs)[None, :T, None, :]
    ref_sin = jnp.sin(freqs)[None, :T, None, :]

    assert cos.shape == (1, T, 1, D // 2) and sin.shape == (1, T, 1, D // 2)
    assert cos.dtype == jnp.float32 and sin.dtype == jnp.float32
    assert jnp.allclose(cos, ref_cos, atol=1e-5, rtol=1e-5)
    assert jnp.allclose(sin, ref_sin, atol=1e-5, rtol=1e-5)

    # Awkward combo exercising the generalized fold + padded tail:
    # half = 48 (not a divisor of 128) and seq_len not a multiple of fold.
    D2, SEQ2 = 96, 100
    cos2, sin2 = make_rotary_tables(D2, base=10000, seq_len=SEQ2)
    cos2 = jax.block_until_ready(cos2)
    sin2 = jax.block_until_ready(sin2)
    f2 = ref_freqs(D2, 10000.0, SEQ2)
    assert cos2.shape == (SEQ2, D2 // 2) and sin2.shape == (SEQ2, D2 // 2)
    assert jnp.allclose(cos2, jnp.cos(f2), atol=1e-5, rtol=1e-5)
    assert jnp.allclose(sin2, jnp.sin(f2), atol=1e-5, rtol=1e-5)

    print("KERNEL_OK")
</pallas_src>

<mosaic_0001>
module attributes {stable_mosaic.version = 11 : i64} {
  func.func @_rotary_kernel(%arg0: i32, %arg1: memref<1x128xf32, #tpu.memory_space<vmem>>, %arg2: memref<1x128xf32, #tpu.memory_space<vmem>>, %arg3: memref<2x16x128xf32, #tpu.memory_space<vmem>>) attributes {dimension_semantics = [#tpu.dimension_semantics<parallel>], iteration_bounds = array<i64: 2>, scalar_prefetch = 0 : i64, scratch_operands = 0 : i64, tpu.core_type = #tpu.core_type<tc>, window_params = [{pipeline_mode = #tpu.pipeline_mode<synchronous>, transform_indices = @transform_0, window_bounds = array<i64: 1, 128>}, {pipeline_mode = #tpu.pipeline_mode<synchronous>, transform_indices = @transform_1, window_bounds = array<i64: 1, 128>}, {transform_indices = @transform_2, window_bounds = array<i64: 2, 16, 128>}]} {
    %c16_i32 = arith.constant 16 : i32
    %0 = arith.muli %arg0, %c16_i32 : i32
    %c0 = arith.constant 0 : index
    %c0_0 = arith.constant 0 : index
    %1 = vector.load %arg1[%c0, %c0_0] : memref<1x128xf32, #tpu.memory_space<vmem>>, vector<1x128xf32>
    %2 = tpu.iota {dimensions = array<i32: 0>} : vector<16x1xi32>
    %3 = arith.sitofp %2 : vector<16x1xi32> to vector<16x1xf32>
    %c0_1 = arith.constant 0 : index
    %c0_2 = arith.constant 0 : index
    %4 = vector.load %arg2[%c0_1, %c0_2] : memref<1x128xf32, #tpu.memory_space<vmem>>, vector<1x128xf32>
    %cst = arith.constant 4.000000e+00 : f32
    %c0_i32 = arith.constant 0 : i32
    %c16_i32_3 = arith.constant 16 : i32
    %5 = arith.muli %c0_i32, %c16_i32_3 : i32
    %6 = tpu.assume_multiple %5, 16 : i32
    %7 = arith.addi %0, %6 : i32
    %8 = arith.sitofp %7 : i32 to f32
    %9 = vector.broadcast %8 : f32 to vector<16x1xf32>
    %10 = arith.addf %3, %9 : vector<16x1xf32>
    %11 = vector.broadcast %cst : f32 to vector<16x1xf32>
    %12 = arith.mulf %10, %11 : vector<16x1xf32>
    %13 = vector.broadcast %12 : vector<16x1xf32> to vector<16x128xf32>
    %14 = vector.broadcast %4 : vector<1x128xf32> to vector<16x128xf32>
    %15 = arith.addf %13, %14 : vector<16x128xf32>
    %16 = vector.broadcast %1 : vector<1x128xf32> to vector<16x128xf32>
    %17 = arith.mulf %15, %16 : vector<16x128xf32>
    %18 = math.cos %17 : vector<16x128xf32>
    %c0_4 = arith.constant 0 : index
    %19 = arith.index_cast %6 : i32 to index
    %c0_5 = arith.constant 0 : index
    %20 = vector.load %arg3[%c0_4, %19, %c0_5] : memref<2x16x128xf32, #tpu.memory_space<vmem>>, vector<1x16x128xf32>
    %21 = vector.shape_cast %20 : vector<1x16x128xf32> to vector<16x128xf32>
    %22 = vector.shape_cast %18 : vector<16x128xf32> to vector<1x16x128xf32>
    tpu.vector_store %arg3[%c0_4, %19, %c0_5], %22 {strides = array<i32>} : memref<2x16x128xf32, #tpu.memory_space<vmem>>, vector<1x16x128xf32>,
    %23 = math.sin %17 : vector<16x128xf32>
    %c1 = arith.constant 1 : index
    %24 = arith.index_cast %6 : i32 to index
    %c0_6 = arith.constant 0 : index
    %25 = vector.load %arg3[%c1, %24, %c0_6] : memref<2x16x128xf32, #tpu.memory_space<vmem>>, vector<1x16x128xf32>
    %26 = vector.shape_cast %25 : vector<1x16x128xf32> to vector<16x128xf32>
    %27 = vector.shape_cast %23 : vector<16x128xf32> to vector<1x16x128xf32>
    tpu.vector_store %arg3[%c1, %24, %c0_6], %27 {strides = array<i32>} : memref<2x16x128xf32, #tpu.memory_space<vmem>>, vector<1x16x128xf32>,
    %c1_i32 = arith.constant 1 : i32
    return
  }
  func.func @transform_0(%arg0: i32) -> (i32, i32) {
    %c0_i32 = arith.constant 0 : i32
    %c0_i32_0 = arith.constant 0 : i32
    %c0_i32_1 = arith.constant 0 : i32
    return %c0_i32, %c0_i32_0 : i32, i32
  }
  func.func @transform_1(%arg0: i32) -> (i32, i32) {
    %c0_i32 = arith.constant 0 : i32
    %c0_i32_0 = arith.constant 0 : i32
    %c0_i32_1 = arith.constant 0 : i32
    return %c0_i32, %c0_i32_0 : i32, i32
  }
  func.func @transform_2(%arg0: i32) -> (i32, i32, i32) {
    %c0_i32 = arith.constant 0 : i32
    %c0_i32_0 = arith.constant 0 : i32
    %c0_i32_1 = arith.constant 0 : i32
    return %c0_i32, %arg0, %c0_i32_0 : i32, i32, i32
  }
}

</mosaic_0001>

<bundles_post_ra>
// kernel: tpu_custom_call.1
= control target key start
LH: loop header
LB: loop body
LE: loop exit
PB: predicated region body
PF: predicated region fallthrough
CT: control target
= control target key end

     0   :  { %7 = vsyncpa [#allocation3], 0  ;;  %s1085_s0 = inlined_call_operand.hbm [shape: f32[1,128], index: 0, kind: input, shape index: {}]   ;;  %s1086_s1 = inlined_call_operand.vmem [shape: f32[1,128], index: 1, kind: input, shape index: {}]   ;;  %s1087_s2 = inlined_call_operand.hbm [shape: f32[2,32,128], index: 2, kind: output, shape index: {}]  }
   0x1   :  { %8 = vsyncpa [#allocation4], 0 }
   0x2   :  { %10 = vsyncpa [#allocation4 + $0x1], 0  ;;  %s900_s9 = smov 0   ;;  %s902_s10 = smov 0  }
   0x3   :  { %s904_s11 = smov 0   ;;  %s906_s12 = smov 0  }
   0x4 LB: > { %s921_s13 = sadd.s32 4294967295, %s869_s12   ;;  %s687_s14 = sadd.s32 4294967294, %s869_s12   ;;  %s869_s12 = sphi %s906_s12, %s1094_s12   ;;  %s865_s11 = sphi %s904_s11, %s1093_s11   ;;  %s861_s10 = sphi %s902_s10, %s1092_s10   ;;  %s857_s9 = sphi %s900_s9, %s1091_s9  }
   0x5   : > { %s925_s15 = sadd.s32 1, %s869_s12   ;;  %s65_s16 = sadd.s32 1, %s865_s11 }
   0x6   : > { %s62_s17 = ssub.s32 %s869_s12, %s925_s15  ;;  %p75_p0 = scmp.ne.s32.totalorder %s865_s11, %s861_s10 }
   0x7   : > { %p63_p1 = scmp.eq.s32.totalorder %s62_s17, 0  ;;  %p76_p2 = scmp.eq.s32.totalorder %s921_s13, 1 }
   0x8   : > { %p81_p3 = scmp.ne.s32.totalorder %s861_s10, %s857_s9  ;;  %p82_p4 = scmp.eq.s32.totalorder %s687_s14, 1 }
   0x9   : > { %s936_s18 = scalar_select %p63_p1, %s865_s11, %s65_s16  }
   0xa   : > { %p938_p5 = por %p76_p2, %p75_p0  ;;  %p942_p6 = por %p82_p4, %p81_p3 }
   0xb   : > { %p688_p7 = scmp.ge.s32.totalorder %s869_s12, 1  ;;  %p89_p8 = scmp.lt.s32.totalorder %s869_s12, 3 }
   0xc   : > { %p748_p9 = scmp.eq.s32.totalorder %s921_s13, 0  ;;  %s871_s22 = smov [#allocation2]  }
   0xd   : > { %p949_p10 = pnand %p688_p7, %p89_p8  ;;  %s102_s23 = sshll.u32 %s871_s22, 4  ;;  %s103_s23 = int_to_ptr.vmem [resolvable:$true] %s102_s23 }
   0xe   : > { %s816_s24 = scalar_lea.vmem %s103_s23, 16  ;;  %s823_s25 = scalar_lea.vmem %s103_s23, 32 }
   0xf   : > { %p740_p11 = pneg %p949_p10  ;;  %p817_p0 = scmp.ne.s32.totalorder %s103_s23, %s816_s24 }
  0x10   : > { %p824_p3 = scmp.lt.s32.totalorder %s103_s23, %s103_s23  ;;  %p825_p4 = scmp.lt.s32.totalorder %s823_s25, %s816_s24 }
  0x11   : > { %p741_p12 = pnand %p748_p9, %p740_p11 }
  0x12   : > { %p826_p7 = por %p825_p4, %p824_p3 }
  0x13   : > { %p807_p13 = pneg %p741_p12 }
  0x15   : > { %p819_p1 = pnand %p817_p0, %p807_p13 }
  0x17   : > { %p820_p2 = pneg %p819_p1 }
  0x19   : > { %p827_p8 = pnand %p826_p7, %p820_p2 }
  0x1b   : > { %830 = shalt.err (!%p827_p8)
}
  0x1c   : > { %743 = dma.hbm_to_vmem [thread:$0]  (!%p741_p12), %s1085_s0, 16, %s103_s23, [#allocation3]  }
  0x1d   : > { %118 = sbr.rel (%p949_p10) target bundleno = 152 (0x98), region = 28 }
  0x22   : > { %848 = dma.done.wait (%p748_p9), [#allocation3], 16  }
  0x23   : > { %850 = vsyncadd (%p748_p9), [#allocation3], 4294967280  ;;  %s693_s28 = sshll.u32 %s921_s13, 4  ;;  %v138_v0 = vlaneseq  ;;  %s132_s30 = sand.u32 1, %s861_s10   ;;  %v694_v7 = vld [vmem:[%s1086_s1] ss:$0 sm:$0xff] }
  0x24   : > { %s145_s29 = scvt.s32.f32 %s693_s28  ;;  %v695_v10 = vld [vmem:[#allocation2] ss:$0 sm:$0xff]  ;;  %v872_v35 = vmov 683565275   ;;  %v873_v37 = vmov 2475754826  }
  0x25   : > { %v139_v1 = vshrl.u32 %v138_v0, 7  ;;  %v874_v39 = vmov 2131351028   ;;  %v875_v41 = vmov 2102212464   ;;  %s692_s5 = sshll.u32 %s132_s30, 5 }
  0x26   : > { %v146_v2 = vstv %s145_s29  ;;  %v876_v43 = vmov 920167782   ;;  %v877_v50 = vmov 1326507024   ;;  %s1040_s6 = scalar_lea.vmem [#allocation5], %s692_s5  ;;  %s588_s7 = scalar_lea.sflag [#allocation4], %s132_s30 }
  0x27   : > { %v141_v3 = vcvt.s32.f32 %v139_v1  ;;  %v140_v4 = vadd.s32 8, %v139_v1 }
  0x29   : > { %v147_v5 = vadd.f32 %v146_v2, %v141_v3  ;;  %v142_v6 = vcvt.s32.f32 %v140_v4 }
  0x2b   : > { %v149_v8 = vmul.f32 4.0, %v147_v5  ;;  %v148_v9 = vadd.f32 %v146_v2, %v142_v6 }
  0x2d   : > { %v157_v11 = vadd.f32 %v694_v7, %v149_v8  ;;  %v150_v12 = vmul.f32 4.0, %v148_v9 }
  0x2f   : > { %v971_v13 = vmul.f32 %v695_v10, %v157_v11  ;;  %v158_v14 = vadd.f32 %v694_v7, %v150_v12 }
  0x31   : > { %v167_v15 = vand.u32 2147483647, %v971_v13  ;;  %v170_v16 = vand.u32 2139095040, %v971_v13  ;;  %v975_v17 = vmul.f32 %v695_v10, %v158_v14  ;;  %vm169_vm14 = vcmp.lt.s32.totalorder %v971_v13, 0 }
  0x33   : > { %v171_v18 = vshrl.u32 %v170_v16, 23  ;;  %v174_v19 = vand.u32 8388607, %v167_v15  ;;  %v270_v20 = vand.u32 2147483647, %v975_v17  ;;  %v273_v21 = vand.u32 2139095040, %v975_v17 }
  0x34   : > { %vm168_vm15 = vcmp.le.f32.partialorder %v167_v15, 0.7853982 }
  0x35   : > { %v696_v22 = vadd.s32 4294967169, %v171_v18  ;;  %v274_v23 = vshrl.u32 %v273_v21, 23  ;;  %v175_v25 = vor.u32 8388608, %v174_v19  ;;  %v983_v27 = vand.u32 8388607, %v270_v20 }
  0x37   : > { %v177_v24 = vadd.s32 1, %v696_v22  ;;  %v700_v26 = vadd.s32 4294967169, %v274_v23  ;;  %v985_v32 = vshll.u32 %v175_v25, 8  ;;  %v278_v33 = vor.u32 8388608, %v983_v27 }
  0x39   : > { %vm178_vm0 = vcmp.gt.s32.totalorder %v177_v24, 0  ;;  %v280_v29 = vadd.s32 1, %v700_v26 }
  0x3a   : > { %v179_v28 = vsel %vm178_vm0, %v177_v24, 0  ;;  %vm272_vm0 = vcmp.lt.s32.totalorder %v975_v17, 0 }
  0x3b   : > { %v180_v30 = vshrl.u32 %v179_v28, 5  ;;  %v181_v31 = vand.u32 31, %v179_v28  ;;  %vm281_vm1 = vcmp.gt.s32.totalorder %v280_v29, 0 }
  0x3c   : > { %v282_v55 = vsel %vm281_vm1, %v280_v29, 0  ;;  %vm271_vm1 = vcmp.le.f32.partialorder %v270_v20, 0.7853982 }
  0x3d   : > { %v182_v34 = vsub.s32 32, %v181_v31  ;;  %v184_v36 = vshll.u32 %v872_v35, %v181_v31  ;;  %v187_v38 = vshll.u32 %v873_v37, %v181_v31  ;;  %v190_v40 = vshll.u32 %v874_v39, %v181_v31 }
  0x3e   : > { %v193_v42 = vshll.u32 %v875_v41, %v181_v31  ;;  %v196_v44 = vshll.u32 %v876_v43, %v181_v31  ;;  %vm199_vm2 = vcmp.lt.s32.totalorder %v180_v30, 1  ;;  %vm200_vm3 = vcmp.lt.s32.totalorder %v180_v30, 2 }
  0x3f   : > { %v183_v45 = vshrl.u32 %v872_v35, %v182_v34  ;;  %v185_v46 = vshrl.u32 %v873_v37, %v182_v34  ;;  %v188_v47 = vshrl.u32 %v874_v39, %v182_v34  ;;  %v191_v48 = vshrl.u32 %v875_v41, %v182_v34 }
  0x40   : > { %v194_v49 = vshrl.u32 %v876_v43, %v182_v34  ;;  %v197_v51 = vshrl.u32 %v877_v50, %v182_v34  ;;  %vm201_vm4 = vcmp.lt.s32.totalorder %v180_v30, 3  ;;  %vm202_vm5 = vcmp.lt.s32.totalorder %v180_v30, 4 }
  0x41   : > { %v186_v52 = vor.u32 %v185_v46, %v184_v36  ;;  %v189_v53 = vor.u32 %v188_v47, %v187_v38  ;;  %v192_v54 = vor.u32 %v191_v48, %v190_v40  ;;  %v283_v58 = vshrl.u32 %v282_v55, 5 }
  0x42   : > { %v195_v56 = vor.u32 %v194_v49, %v193_v42  ;;  %v198_v57 = vor.u32 %v197_v51, %v196_v44  ;;  %v284_v59 = vand.u32 31, %v282_v55 }
  0x43   : > { %v203_v60 = vsel %vm199_vm2, %v183_v45, %v186_v52  ;;  %v204_v61 = vsel %vm202_vm5, %v192_v54, 2102212464  ;;  %v207_v62 = vsel %vm199_vm2, %v186_v52, %v189_v53  ;;  %v211_v63 = vsel %vm199_vm2, %v189_v53, %v192_v54 }
  0x44   : > { %v205_v0 = vsel %vm201_vm4, %v189_v53, %v204_v61  ;;  %v208_v1 = vsel %vm202_vm5, %v195_v56, 920167782  ;;  %v212_v2 = vsel %vm202_vm5, %v198_v57, 1326507024  ;;  %v285_v3 = vsub.s32 32, %v284_v59 }
  0x45   : > { %v206_v4 = vsel %vm200_vm3, %v203_v60, %v205_v0  ;;  %v209_v5 = vsel %vm201_vm4, %v192_v54, %v208_v1  ;;  %v213_v6 = vsel %vm201_vm4, %v195_v56, %v212_v2  ;;  %v287_v7 = vshll.u32 %v872_v35, %v284_v59 }
  0x46   : > { %v210_v8 = vsel %vm200_vm3, %v207_v62, %v209_v5  ;;  %v214_v9 = vsel %vm200_vm3, %v211_v63, %v213_v6  ;;  %v222_v10 = vmul.u32 %v985_v32, %v206_v4  ;;  %v286_v11 = vshrl.u32 %v872_v35, %v285_v3 }
  0x47   : > { %v1000_v12 = vmul.u32.u64.low %v985_v32, %v214_v9  ;;  %v1001_v14 = vmul.u32.u64.high %v985_v32, %v214_v9, %v1000_v12  ;;  %v1004_v16 = vmul.u32.u64.low %v985_v32, %v210_v8  ;;  %v1005_v18 = vmul.u32.u64.high %v985_v32, %v210_v8, %v1004_v16 }
  0x48   : > { %v288_v19 = vshrl.u32 %v873_v37, %v285_v3  ;;  %v290_v21 = vshll.u32 %v873_v37, %v284_v59  ;;  %v291_v22 = vshrl.u32 %v874_v39, %v285_v3  ;;  %v293_v23 = vshll.u32 %v874_v39, %v284_v59 }
  0x49   : > { %v294_v24 = vshrl.u32 %v875_v41, %v285_v3  ;;  %v296_v25 = vshll.u32 %v875_v41, %v284_v59  ;;  %v297_v26 = vshrl.u32 %v876_v43, %v285_v3  ;;  %v299_v28 = vshll.u32 %v876_v43, %v284_v59 }
  0x4a   : > { %v289_v29 = vor.u32 %v288_v19, %v287_v7  ;;  %v292_v30 = vor.u32 %v291_v22, %v290_v21  ;;  %v300_v31 = vshrl.u32 %v877_v50, %v285_v3  ;;  %vm302_vm6 = vcmp.lt.s32.totalorder %v283_v58, 1 }
  0x4b   : > { %vm224_vm7 = vc.u32 %v1001_v14, %v1004_v16  ;;  %v225_v34 = vadd.s32 1, %v1005_v18  ;;  %v295_v35 = vor.u32 %v294_v24, %v293_v23  ;;  %v318_v32 = vshll.u32 %v278_v33, 8 }
  0x4c   : > { %v298_v36 = vor.u32 %v297_v26, %v296_v25  ;;  %v301_v37 = vor.u32 %v300_v31, %v299_v28  ;;  %vm303_vm8 = vcmp.lt.s32.totalorder %v283_v58, 2  ;;  %vm304_vm9 = vcmp.lt.s32.totalorder %v283_v58, 3 }
  0x4d   : > { %v226_v38 = vsel %vm224_vm7, %v225_v34, %v1005_v18  ;;  %vm305_vm10 = vcmp.lt.s32.totalorder %v283_v58, 4  ;;  %v306_v39 = vsel %vm302_vm6, %v286_v11, %v289_v29  ;;  %v310_v40 = vsel %vm302_vm6, %v289_v29, %v292_v30 }
  0x4e   : > { %v227_v41 = vadd.s32 %v226_v38, %v222_v10  ;;  %v307_v42 = vsel %vm305_vm10, %v295_v35, 2102212464  ;;  %v311_v43 = vsel %vm305_vm10, %v298_v36, 920167782  ;;  %v314_v44 = vsel %vm302_vm6, %v292_v30, %v295_v35 }
  0x4f   : > { %v308_v45 = vsel %vm304_vm9, %v292_v30, %v307_v42  ;;  %v312_v46 = vsel %vm304_vm9, %v295_v35, %v311_v43  ;;  %v315_v27 = vsel %vm305_vm10, %v301_v37, 1326507024  ;;  %v223_v5 = vadd.s32 %v1004_v16, %v1001_v14 }
  0x50   : > { %v228_v33 = vadd.s32 536870912, %v227_v41  ;;  %v313_v47 = vsel %vm303_vm8, %v310_v40, %v312_v46  ;;  %v316_v48 = vsel %vm304_vm9, %v298_v36, %v315_v27  ;;  %v309_v49 = vsel %vm303_vm8, %v306_v39, %v308_v45 }
  0x51   : > { %v317_v50 = vsel %vm303_vm8, %v314_v44, %v316_v48  ;;  %v1018_v51 = vmul.u32.u64.low %v318_v32, %v313_v47  ;;  %v1019_v52 = vmul.u32.u64.high %v318_v32, %v313_v47, %v1018_v51  ;;  %v325_v57 = vmul.u32 %v318_v32, %v309_v49 }
  0x52   : > { %v229_v53 = vshrl.u32 %v228_v33, 30  ;;  %v1021_v54 = vmul.u32.u64.low %v318_v32, %v317_v50  ;;  %v1022_v55 = vmul.u32.u64.high %v318_v32, %v317_v50, %v1021_v54  ;;  %vm259_vm8 = vweird.f32 %v971_v13 }
  0x53   : > { %v328_v59 = vadd.s32 1, %v1019_v52 }
  0x54   : > { %v230_v56 = vshll.u32 %v229_v53, 30  ;;  %vm327_vm11 = vc.u32 %v1022_v55, %v1018_v51  ;;  %v326_v29 = vadd.s32 %v1018_v51, %v1022_v55  ;;  %v253_v30 = vsub.s32 4, %v229_v53 }
  0x55   : > { %v329_v61 = vsel %vm327_vm11, %v328_v59, %v1019_v52 }
  0x56   : > { %v231_v60 = vsub.s32 %v227_v41, %v230_v56  ;;  %v330_v63 = vadd.s32 %v329_v61, %v325_v57  ;;  %v254_v39 = vsel %vm169_vm14, %v253_v30, %v229_v53 }
  0x57   : > { %v256_v45 = vsel %vm168_vm15, 0, %v254_v39 }
  0x58   : > { %v233_v62 = vsub.s32 0, %v231_v60  ;;  %v331_v0 = vadd.s32 536870912, %v330_v63  ;;  %v468_v33 = vadd.s32 3, %v256_v45  ;;  %v260_v48 = vand.u32 3, %v256_v45 }
  0x5a   : > { %v697_v58 = vmin.u32 %v233_v62, %v231_v60  ;;  %v332_v2 = vshrl.u32 %v331_v0, 30  ;;  %v469_v50 = vand.u32 3, %v468_v33  ;;  %vm265_vm2 = vcmp.eq.s32.totalorder %v260_v48, 2 }
  0x5b   : > { %vm262_vm4 = vcmp.eq.s32.totalorder %v260_v48, 0  ;;  %vm261_vm6 = vcmp.lt.s32.totalorder %v260_v48, 2 }
  0x5c   : > { %v235_v1 = vclz %v697_v58  ;;  %v333_v4 = vshll.u32 %v332_v2, 30  ;;  %v356_v15 = vsub.s32 4, %v332_v2  ;;  %vm474_vm3 = vcmp.eq.s32.totalorder %v469_v50, 2 }
  0x5d   : > { %vm471_vm5 = vcmp.eq.s32.totalorder %v469_v50, 0  ;;  %vm470_vm7 = vcmp.lt.s32.totalorder %v469_v50, 2 }
  0x5e   : > { %v698_v3 = vadd.s32 4294967294, %v235_v1  ;;  %v334_v7 = vsub.s32 %v330_v63, %v333_v4  ;;  %v357_v51 = vsel %vm272_vm0, %v356_v15, %v332_v2 }
  0x5f   : > { %v359_v54 = vsel %vm271_vm1, 0, %v357_v51 }
  0x60   : > { %vm699_vm12 = vcmp.lt.s32.totalorder %v698_v3, 0  ;;  %v336_v11 = vsub.s32 0, %v334_v7  ;;  %v363_v2 = vand.u32 3, %v359_v54 }
  0x61   : > { %v238_v6 = vsel %vm699_vm12, 0, %v698_v3 }
  0x62   : > { %v239_v8 = vsub.s32 32, %v238_v6  ;;  %v240_v9 = vshll.u32 %v231_v60, %v238_v6  ;;  %v243_v10 = vsub.s32 4294967266, %v238_v6  ;;  %v701_v19 = vmin.u32 %v336_v11, %v334_v7 }
  0x63   : > { %v572_v60 = vadd.s32 3, %v359_v54  ;;  %vm368_vm9 = vcmp.eq.s32.totalorder %v363_v2, 2  ;;  %vm365_vm11 = vcmp.eq.s32.totalorder %v363_v2, 0 }
  0x64   : > { %v241_v12 = vshrl.u32 %v223_v5, %v239_v8  ;;  %v244_v18 = vadd.s32 127, %v243_v10  ;;  %v338_v23 = vclz %v701_v19 }
  0x65   : > { %v573_v3 = vand.u32 3, %v572_v60 }
  0x66   : > { %v242_v21 = vor.u32 %v241_v12, %v240_v9  ;;  %v245_v22 = vshll.u32 %v244_v18, 23  ;;  %v702_v26 = vadd.s32 4294967294, %v338_v23 }
  0x67   : > { %vm578_vm10 = vcmp.eq.s32.totalorder %v573_v3, 2  ;;  %vm575_vm12 = vcmp.eq.s32.totalorder %v573_v3, 0 }
  0x68   : > { %v246_v24 = vor.u32 4788187, %v245_v22  ;;  %v249_v25 = vcvt.s32.f32 %v242_v21  ;;  %vm703_vm13 = vcmp.lt.s32.totalorder %v702_v26, 0 }
  0x69   : > { %v341_v16 = vsel %vm703_vm13, 0, %v702_v26  ;;  %vm364_vm13 = vcmp.lt.s32.totalorder %v363_v2, 2 }
  0x6a   : > { %v247_v28 = vand.u32 2147483647, %v246_v24  ;;  %v342_v31 = vsub.s32 32, %v341_v16  ;;  %v343_v34 = vshll.u32 %v334_v7, %v341_v16  ;;  %v346_v35 = vsub.s32 4294967266, %v341_v16 }
  0x6c   : > { %v250_v14 = vmul.f32 %v249_v25, %v247_v28  ;;  %v344_v36 = vshrl.u32 %v326_v29, %v342_v31  ;;  %v347_v37 = vadd.s32 127, %v346_v35 }
  0x6e   : > { %v251_v32 = vxor.u32 2147483648, %v250_v14  ;;  %v345_v41 = vor.u32 %v344_v36, %v343_v34  ;;  %v348_v42 = vshll.u32 %v347_v37, 23 }
  0x70   : > { %v252_v38 = vsel %vm169_vm14, %v251_v32, %v250_v14  ;;  %v349_v43 = vor.u32 4788187, %v348_v42  ;;  %v352_v44 = vcvt.s32.f32 %v345_v41  ;;  %vm574_vm14 = vcmp.lt.s32.totalorder %v573_v3, 2 }
  0x71   : > { %v255_v40 = vsel %vm168_vm15, %v971_v13, %v252_v38  ;;  %vm362_vm15 = vweird.f32 %v975_v17 }
  0x72   : > { %797 = vcosq.f32 %v255_v40  ;;  %v350_v46 = vand.u32 2147483647, %v349_v43 }
  0x73   : > { %799 = vsinq.f32 %v255_v40 }
  0x74   : > { %v353_v27 = vmul.f32 %v352_v44, %v350_v46 }
  0x76   : > { %v354_v47 = vxor.u32 2147483648, %v353_v27 }
  0x78   : > { %v355_v49 = vsel %vm272_vm0, %v354_v47, %v353_v27 }
  0x79   : > { %v358_v52 = vsel %vm271_vm1, %v975_v17, %v355_v49 }
  0x7a   : > { %801 = vcosq.f32 %v358_v52 }
  0x7b   : > { %803 = vsinq.f32 %v358_v52 }
  0x7f   : > { %v798_v53 = vpop.eup %797 }
  0x80   : > { %v800_v55 = vpop.eup %799  ;;  %v266_v56 = vxor.u32 2147483648, %v798_v53 }
  0x81   : > { %v263_v20 = vxor.u32 2147483648, %v800_v55 }
  0x82   : > { %v267_v57 = vsel %vm265_vm2, %v266_v56, %v800_v55  ;;  %v476_v59 = vsel %vm474_vm3, %v266_v56, %v800_v55 }
  0x83   : > { %v264_v61 = vsel %vm262_vm4, %v798_v53, %v263_v20  ;;  %v473_v62 = vsel %vm471_vm5, %v798_v53, %v263_v20 }
  0x84   : > { %v268_v63 = vsel %vm261_vm6, %v264_v61, %v267_v57  ;;  %v477_v58 = vsel %vm470_vm7, %v473_v62, %v476_v59 }
  0x85   : > { %v269_v0 = vsel %vm259_vm8, nan, %v268_v63  ;;  %v478_v1 = vsel %vm259_vm8, nan, %v477_v58 }
  0x86   : > { %373 = vst [vmem:[%s1040_s6] sm:$0xff] %v269_v0  ;;  %712 = vst [vmem:[%s1040_s6 + $0x10] sm:$0xff] %v478_v1 }
  0x87   : > { %v802_v4 = vpop.eup %801 }
  0x88   : > { %v804_v13 = vpop.eup %803  ;;  %v369_v5 = vxor.u32 2147483648, %v802_v4 }
  0x89   : > { %v366_v6 = vxor.u32 2147483648, %v804_v13 }
  0x8a   : > { %v370_v7 = vsel %vm368_vm9, %v369_v5, %v804_v13  ;;  %v580_v8 = vsel %vm578_vm10, %v369_v5, %v804_v13 }
  0x8b   : > { %v367_v9 = vsel %vm365_vm11, %v802_v4, %v366_v6  ;;  %v577_v10 = vsel %vm575_vm12, %v802_v4, %v366_v6 }
  0x8c   : > { %v371_v11 = vsel %vm364_vm13, %v367_v9, %v370_v7  ;;  %v581_v12 = vsel %vm574_vm14, %v577_v10, %v580_v8 }
  0x8d   : > { %v372_v18 = vsel %vm362_vm15, nan, %v371_v11  ;;  %v582_v19 = vsel %vm362_vm15, nan, %v581_v12 }
  0x8e   : > { %374 = vst [vmem:[%s1040_s6 + $0x8] sm:$0xff] %v372_v18  ;;  %713 = vst [vmem:[%s1040_s6 + $0x18] sm:$0xff] %v582_v19 }
  0x8f   : > { %s719_s8 = sshll.u32 %s921_s13, 8  ;;  %s611_s14 = sshll.u32 %s1040_s6, 4  ;;  %s612_s14 = int_to_ptr.vmem [resolvable:$true] %s611_s14 }
  0x90   : > { %s600_s21 = scalar_lea.hbm %s1087_s2, %s719_s8  ;;  %s878_s22 = smov 256  }
  0x91   : > { %732 = sst [smem:[#allocation7]] (%p938_p5), %s878_s22  ;;  %s879_s23 = smov 512  }
  0x92   : > { %733 = sst [smem:[#allocation7 + $0x1]] (%p938_p5), %s879_s23  ;;  %s880_s24 = smov 2  }
  0x93   : > { %734 = sst [smem:[#allocation7 + $0x2]] (%p938_p5), %s880_s24  ;;  %s881_s25 = smov 128  }
  0x94   : > { %735 = sst [smem:[#allocation7 + $0x3]] (%p938_p5), %s881_s25  ;;  %s882_s13 = smov 8  }
  0x95   : > { %736 = sst [smem:[#allocation7 + $0x4]] (%p938_p5), %s881_s25  ;;  %s883_s26 = smov 131072  }
  0x96   : > { %737 = sst [smem:[#allocation7 + $0x5]] (%p938_p5), %s882_s13  ;;  %s884_s27 = smov 0  }
  0x97   : > { %738 = dma.general (%p938_p5), %s612_s14, 512, %s600_s21, %s588_s7, %s883_s26, [#allocation7], %s884_s27, 0  }
  0x98 PF: > { %p750_p9 = scmp.ge.s32.totalorder %s869_s12, 2  ;;  %s639_s28 = sand.u32 1, %s857_s9  }
  0x99   : > { %s640_s29 = scalar_lea.sflag [#allocation4], %s639_s28 }
  0x9a   : > { %p745_p10 = pnand %p750_p9, %p942_p6 }
  0x9c   : > { %p746_p11 = pneg %p745_p10 }
  0x9e   : > { %852 = dma.done.wait (%p746_p11), %s640_s29, 512  }
  0x9f   : > { %854 = vsyncadd (%p746_p11), %s640_s29, 4294966784  ;;  %p13_p12 = scmp.ge.s32.totalorder %s925_s15, 4   ;;  %s1091_s9 = smov %s861_s10 }
  0xa0   : > { %s1092_s10 = smov %s865_s11  ;;  %s1093_s11 = smov %s936_s18 }
  0xa1   : > { %s1094_s12 = smov %s925_s15  ;;  %15 = sbr.rel (!%p13_p12) target bundleno = 4 (0x4), region = 71 }
  0xa6   :  { %645 = vsyncpa [#allocation3], 1 }
  0xa7   :  { %647 = vsyncpa [#allocation3 + $0x1], 1 }
  0xa8   :  { %648 = vsyncpa [#allocation4], 1 }
  0xa9   :  { %650 = vsyncpa [#allocation4 + $0x1], 1 }

</bundles_post_ra>
